<compile_context>
chip_gen: v7x
topology: tpu7x:2x2x1
jax: 0.10.0
libtpu: 0.0.40
codegen_flags: <defaults>
</compile_context>

<pallas_src>
import math
from functools import partial

import jax
import jax.numpy as jnp
from jax import lax
from jax.experimental import pallas as pl
from jax.experimental.pallas import tpu as pltpu


def _reward_traj_kernel(idx_ref, rewards_ref, feedback_ref, out_ref, *,
                        num_steps, inv_num_steps, inv_noise, log_noise,
                        half_log_2pi):
    """Fused gather + exp + mean + Normal(mean, noise).log_prob(feedback)."""
    rewards = rewards_ref[...]                      # (1, S*A) f32, lane-dense
    exp_rew = jnp.exp(rewards)                      # EUP, whole table once
    lane_ids = lax.broadcasted_iota(jnp.int32, rewards.shape, 1)

    # Trajectory loop: pure-VPU hit-count accumulation (no XLU reduce inside).
    # Handles duplicate (s, a) pairs exactly like PyTorch advanced indexing
    # (each occurrence contributes once to the sum).
    def body(t, counts):
        hit = lane_ids == idx_ref[t]                # scalar SMEM load + compare
        return counts + hit.astype(jnp.float32)     # VPU add

    counts = lax.fori_loop(0, num_steps, body,
                           jnp.zeros_like(rewards), unroll=True)

    # Single cross-lane reduction after the loop. The where-select guards
    # against exp(unvisited) == inf producing 0 * inf = NaN.
    traj_sum = jnp.sum(jnp.where(counts > 0.0, counts * exp_rew,
                                 jnp.float32(0.0)))
    mean = traj_sum * jnp.float32(inv_num_steps)

    # Normal(mean, noise).log_prob(feedback), matching torch.distributions.Normal
    fb = feedback_ref[...]                          # (1, TF) f32 tile
    z = (fb - mean) * jnp.float32(inv_noise)
    out_ref[...] = (-0.5 * z * z
                    - jnp.float32(log_noise)
                    - jnp.float32(half_log_2pi))


def reward_model_trajectory_forward(rewards, states, actions, feedback, noise):
    """
    rewards : (num_states, num_actions) f32 parameter
    states  : (T,) int32 flattened trajectory states
    actions : (T,) int32 flattened trajectory actions
    feedback: (F,) f32 feedback values
    returns : (F,) f32 log-probabilities (one per feedback element)
    """
    S, A = rewards.shape
    T = int(states.shape[0])
    F = int(feedback.shape[0])
    noise = float(noise)
    if noise == 0.0:                  # mirror the module's __init__ guard
        noise = 0.01

    # Lane-dense flattening: one f32 vreg when S*A == 128.
    SA = S * A
    rewards_flat = rewards.reshape(1, SA).astype(jnp.float32)
    flat_idx = (states.astype(jnp.int32) * jnp.int32(A)
                + actions.astype(jnp.int32))

    # Pad feedback to a multiple of 128 lanes -> unmasked vector stores;
    # grid over feedback tiles gives a "parallel" axis for v7x megacore.
    TF = 128
    F_pad = ((F + TF - 1) // TF) * TF
    feedback2d = jnp.zeros((1, F_pad), jnp.float32)
    feedback2d = feedback2d.at[0, :F].set(feedback.astype(jnp.float32))

    kernel = partial(_reward_traj_kernel,
                     num_steps=T,
                     inv_num_steps=1.0 / T,
                     inv_noise=1.0 / noise,
                     log_noise=math.log(noise),
                     half_log_2pi=0.5 * math.log(2.0 * math.pi))

    # TODO(synk): for very large reward tables, switch the gather to a
    # scalar-prefetch-driven per-row BlockSpec (grid over T) instead of
    # loading the full table; at these shapes the full table is one vreg.
    out = pl.pallas_call(
        kernel,
        out_shape=jax.ShapeDtypeStruct((1, F_pad), jnp.float32),
        grid_spec=pltpu.PrefetchScalarGridSpec(
            num_scalar_prefetch=1,            # flat (state*A + action) indices -> SMEM
            grid=(F_pad // TF,),
            in_specs=[
                pl.BlockSpec((1, SA), lambda i, idx: (0, 0)),
                pl.BlockSpec((1, TF), lambda i, idx: (0, i)),
            ],
            out_specs=pl.BlockSpec((1, TF), lambda i, idx: (0, i)),
        ),
        compiler_params=pltpu.CompilerParams(
            dimension_semantics=("parallel",)),
    )(flat_idx, rewards_flat, feedback2d)
    return out[0, :F]


if __name__ == "__main__":
    # Small, deterministic setup consistent with the module's __init__.
    num_states, num_actions = 16, 8
    noise = 0.1                      # module would force 0.01 if noise == 0
    key = jax.random.PRNGKey(0)
    k_r, k_s, k_a, k_f = jax.random.split(key, 4)

    # nn.Parameter(torch.zeros(...)) -> deterministic init; use small values so
    # the forward is non-trivial (all-zeros would also work).
    rewards = 0.1 * jax.random.normal(k_r, (num_states, num_actions), jnp.float32)

    # 3 trajectories of 4 (state, action) steps each, flattened (T = 12).
    T = 12
    states = jax.random.randint(k_s, (T,), 0, num_states, jnp.int32)
    actions = jax.random.randint(k_a, (T,), 0, num_actions, jnp.int32)

    # 6 simulated feedback values.
    feedback = jax.random.normal(k_f, (6,), jnp.float32)

    out = reward_model_trajectory_forward(rewards, states, actions, feedback, noise)
    out = jax.block_until_ready(out)

    # Pure-JAX reference of the same semantics (gather + exp + mean + log_prob).
    mean_ref = jnp.sum(jnp.exp(rewards[states, actions])) / T
    z = (feedback - mean_ref) / noise
    ref = (-0.5 * z * z - jnp.log(jnp.float32(noise))
           - 0.5 * jnp.log(2.0 * jnp.float32(math.pi)))
    assert jnp.allclose(out, ref, atol=1e-5, rtol=1e-5), (out, ref)

    print("KERNEL_OK")
</pallas_src>

<mosaic_0001>
module attributes {stable_mosaic.version = 11 : i64} {
  func.func @_reward_traj_kernel(%arg0: i32, %arg1: memref<12xi32, #tpu.memory_space<smem>>, %arg2: memref<1x128xf32, #tpu.memory_space<vmem>>, %arg3: memref<1x128xf32, #tpu.memory_space<vmem>>, %arg4: memref<1x128xf32, #tpu.memory_space<vmem>>) attributes {dimension_semantics = [#tpu.dimension_semantics<parallel>], iteration_bounds = array<i64: 1>, scalar_prefetch = 1 : i64, scratch_operands = 0 : i64, tpu.core_type = #tpu.core_type<tc>, window_params = [{pipeline_mode = #tpu.pipeline_mode<synchronous>, transform_indices = @transform_0, window_bounds = array<i64: 1, 128>}, {transform_indices = @transform_1, window_bounds = array<i64: 1, 128>}, {transform_indices = @transform_2, window_bounds = array<i64: 1, 128>}]} {
    %c0 = arith.constant 0 : index
    %c0_0 = arith.constant 0 : index
    %0 = vector.load %arg2[%c0, %c0_0] : memref<1x128xf32, #tpu.memory_space<vmem>>, vector<1x128xf32>
    %1 = math.exp %0 : vector<1x128xf32>
    %2 = tpu.iota {dimensions = array<i32: 1>} : vector<1x128xi32>
    %cst = arith.constant 0.000000e+00 : f32
    %3 = vector.broadcast %cst : f32 to vector<1x128xf32>
    %c0_i32 = arith.constant 0 : i32
    %4 = arith.index_cast %c0_i32 : i32 to index
    %5 = memref.load %arg1[%4] : memref<12xi32, #tpu.memory_space<smem>>
    %6 = vector.broadcast %5 : i32 to vector<1x128xi32>
    %7 = arith.cmpi eq, %2, %6 : vector<1x128xi32>
    %8 = arith.extui %7 : vector<1x128xi1> to vector<1x128xi32>
    %9 = arith.sitofp %8 : vector<1x128xi32> to vector<1x128xf32>
    %10 = arith.addf %3, %9 : vector<1x128xf32>
    %c1_i32 = arith.constant 1 : i32
    %11 = arith.index_cast %c1_i32 : i32 to index
    %12 = memref.load %arg1[%11] : memref<12xi32, #tpu.memory_space<smem>>
    %13 = vector.broadcast %12 : i32 to vector<1x128xi32>
    %14 = arith.cmpi eq, %2, %13 : vector<1x128xi32>
    %15 = arith.extui %14 : vector<1x128xi1> to vector<1x128xi32>
    %16 = arith.sitofp %15 : vector<1x128xi32> to vector<1x128xf32>
    %17 = arith.addf %10, %16 : vector<1x128xf32>
    %c2_i32 = arith.constant 2 : i32
    %18 = arith.index_cast %c2_i32 : i32 to index
    %19 = memref.load %arg1[%18] : memref<12xi32, #tpu.memory_space<smem>>
    %20 = vector.broadcast %19 : i32 to vector<1x128xi32>
    %21 = arith.cmpi eq, %2, %20 : vector<1x128xi32>
    %22 = arith.extui %21 : vector<1x128xi1> to vector<1x128xi32>
    %23 = arith.sitofp %22 : vector<1x128xi32> to vector<1x128xf32>
    %24 = arith.addf %17, %23 : vector<1x128xf32>
    %c3_i32 = arith.constant 3 : i32
    %25 = arith.index_cast %c3_i32 : i32 to index
    %26 = memref.load %arg1[%25] : memref<12xi32, #tpu.memory_space<smem>>
    %27 = vector.broadcast %26 : i32 to vector<1x128xi32>
    %28 = arith.cmpi eq, %2, %27 : vector<1x128xi32>
    %29 = arith.extui %28 : vector<1x128xi1> to vector<1x128xi32>
    %30 = arith.sitofp %29 : vector<1x128xi32> to vector<1x128xf32>
    %31 = arith.addf %24, %30 : vector<1x128xf32>
    %c4_i32 = arith.constant 4 : i32
    %32 = arith.index_cast %c4_i32 : i32 to index
    %33 = memref.load %arg1[%32] : memref<12xi32, #tpu.memory_space<smem>>
    %34 = vector.broadcast %33 : i32 to vector<1x128xi32>
    %35 = arith.cmpi eq, %2, %34 : vector<1x128xi32>
    %36 = arith.extui %35 : vector<1x128xi1> to vector<1x128xi32>
    %37 = arith.sitofp %36 : vector<1x128xi32> to vector<1x128xf32>
    %38 = arith.addf %31, %37 : vector<1x128xf32>
    %c5_i32 = arith.constant 5 : i32
    %39 = arith.index_cast %c5_i32 : i32 to index
    %40 = memref.load %arg1[%39] : memref<12xi32, #tpu.memory_space<smem>>
    %41 = vector.broadcast %40 : i32 to vector<1x128xi32>
    %42 = arith.cmpi eq, %2, %41 : vector<1x128xi32>
    %43 = arith.extui %42 : vector<1x128xi1> to vector<1x128xi32>
    %44 = arith.sitofp %43 : vector<1x128xi32> to vector<1x128xf32>
    %45 = arith.addf %38, %44 : vector<1x128xf32>
    %c6_i32 = arith.constant 6 : i32
    %46 = arith.index_cast %c6_i32 : i32 to index
    %47 = memref.load %arg1[%46] : memref<12xi32, #tpu.memory_space<smem>>
    %48 = vector.broadcast %47 : i32 to vector<1x128xi32>
    %49 = arith.cmpi eq, %2, %48 : vector<1x128xi32>
    %50 = arith.extui %49 : vector<1x128xi1> to vector<1x128xi32>
    %51 = arith.sitofp %50 : vector<1x128xi32> to vector<1x128xf32>
    %52 = arith.addf %45, %51 : vector<1x128xf32>
    %c7_i32 = arith.constant 7 : i32
    %53 = arith.index_cast %c7_i32 : i32 to index
    %54 = memref.load %arg1[%53] : memref<12xi32, #tpu.memory_space<smem>>
    %55 = vector.broadcast %54 : i32 to vector<1x128xi32>
    %56 = arith.cmpi eq, %2, %55 : vector<1x128xi32>
    %57 = arith.extui %56 : vector<1x128xi1> to vector<1x128xi32>
    %58 = arith.sitofp %57 : vector<1x128xi32> to vector<1x128xf32>
    %59 = arith.addf %52, %58 : vector<1x128xf32>
    %c8_i32 = arith.constant 8 : i32
    %60 = arith.index_cast %c8_i32 : i32 to index
    %61 = memref.load %arg1[%60] : memref<12xi32, #tpu.memory_space<smem>>
    %62 = vector.broadcast %61 : i32 to vector<1x128xi32>
    %63 = arith.cmpi eq, %2, %62 : vector<1x128xi32>
    %64 = arith.extui %63 : vector<1x128xi1> to vector<1x128xi32>
    %65 = arith.sitofp %64 : vector<1x128xi32> to vector<1x128xf32>
    %66 = arith.addf %59, %65 : vector<1x128xf32>
    %c9_i32 = arith.constant 9 : i32
    %67 = arith.index_cast %c9_i32 : i32 to index
    %68 = memref.load %arg1[%67] : memref<12xi32, #tpu.memory_space<smem>>
    %69 = vector.broadcast %68 : i32 to vector<1x128xi32>
    %70 = arith.cmpi eq, %2, %69 : vector<1x128xi32>
    %71 = arith.extui %70 : vector<1x128xi1> to vector<1x128xi32>
    %72 = arith.sitofp %71 : vector<1x128xi32> to vector<1x128xf32>
    %73 = arith.addf %66, %72 : vector<1x128xf32>
    %c10_i32 = arith.constant 10 : i32
    %74 = arith.index_cast %c10_i32 : i32 to index
    %75 = memref.load %arg1[%74] : memref<12xi32, #tpu.memory_space<smem>>
    %76 = vector.broadcast %75 : i32 to vector<1x128xi32>
    %77 = arith.cmpi eq, %2, %76 : vector<1x128xi32>
    %78 = arith.extui %77 : vector<1x128xi1> to vector<1x128xi32>
    %79 = arith.sitofp %78 : vector<1x128xi32> to vector<1x128xf32>
    %80 = arith.addf %73, %79 : vector<1x128xf32>
    %c11_i32 = arith.constant 11 : i32
    %81 = arith.index_cast %c11_i32 : i32 to index
    %82 = memref.load %arg1[%81] : memref<12xi32, #tpu.memory_space<smem>>
    %83 = vector.broadcast %82 : i32 to vector<1x128xi32>
    %84 = arith.cmpi eq, %2, %83 : vector<1x128xi32>
    %85 = arith.extui %84 : vector<1x128xi1> to vector<1x128xi32>
    %86 = arith.sitofp %85 : vector<1x128xi32> to vector<1x128xf32>
    %87 = arith.addf %80, %86 : vector<1x128xf32>
    %c12_i32 = arith.constant 12 : i32
    %cst_1 = arith.constant 0.000000e+00 : f32
    %88 = vector.broadcast %cst_1 : f32 to vector<1x128xf32>
    %89 = arith.cmpf ogt, %87, %88 : vector<1x128xf32>
    %90 = arith.mulf %87, %1 : vector<1x128xf32>
    %cst_2 = arith.constant 0.000000e+00 : f32
    %91 = vector.broadcast %cst_2 : f32 to vector<1x128xf32>
    %92 = arith.select %89, %90, %91 : vector<1x128xi1>, vector<1x128xf32>
    %93 = vector.shape_cast %92 : vector<1x128xf32> to vector<1x1x128xf32>
    %cst_3 = arith.constant dense<0.000000e+00> : vector<1xf32>
    %94 = vector.multi_reduction <add>, %93, %cst_3 [1, 2] : vector<1x1x128xf32> to vector<1xf32>
    %95 = vector.shape_cast %94 : vector<1xf32> to vector<1x1x1xf32>
    %96 = vector.extract %95[0, 0, 0] : f32 from vector<1x1x1xf32>
    %cst_4 = arith.constant 0.0833333358 : f32
    %97 = arith.mulf %96, %cst_4 : f32
    %c0_5 = arith.constant 0 : index
    %c0_6 = arith.constant 0 : index
    %98 = vector.load %arg3[%c0_5, %c0_6] : memref<1x128xf32, #tpu.memory_space<vmem>>, vector<1x128xf32>
    %99 = vector.broadcast %97 : f32 to vector<1x128xf32>
    %100 = arith.subf %98, %99 : vector<1x128xf32>
    %cst_7 = arith.constant 1.000000e+01 : f32
    %101 = vector.broadcast %cst_7 : f32 to vector<1x128xf32>
    %102 = arith.mulf %100, %101 : vector<1x128xf32>
    %cst_8 = arith.constant -5.000000e-01 : f32
    %103 = vector.broadcast %cst_8 : f32 to vector<1x128xf32>
    %104 = arith.mulf %103, %102 : vector<1x128xf32>
    %105 = arith.mulf %104, %102 : vector<1x128xf32>
    %cst_9 = arith.constant -2.30258512 : f32
    %106 = vector.broadcast %cst_9 : f32 to vector<1x128xf32>
    %107 = arith.subf %105, %106 : vector<1x128xf32>
    %cst_10 = arith.constant 0.918938517 : f32
    %108 = vector.broadcast %cst_10 : f32 to vector<1x128xf32>
    %109 = arith.subf %107, %108 : vector<1x128xf32>
    %c0_11 = arith.constant 0 : index
    %c0_12 = arith.constant 0 : index
    %110 = vector.load %arg4[%c0_11, %c0_12] : memref<1x128xf32, #tpu.memory_space<vmem>>, vector<1x128xf32>
    tpu.vector_store %arg4[%c0_11, %c0_12], %109 {strides = array<i32>} : memref<1x128xf32, #tpu.memory_space<vmem>>, vector<1x128xf32>,
    return
  }
  func.func @transform_0(%arg0: i32, %arg1: memref<12xi32, #tpu.memory_space<smem>>) -> (i32, i32) {
    %c0_i32 = arith.constant 0 : i32
    %c0_i32_0 = arith.constant 0 : i32
    %c0_i32_1 = arith.constant 0 : i32
    return %c0_i32, %c0_i32_0 : i32, i32
  }
  func.func @transform_1(%arg0: i32, %arg1: memref<12xi32, #tpu.memory_space<smem>>) -> (i32, i32) {
    %c0_i32 = arith.constant 0 : i32
    %c0_i32_0 = arith.constant 0 : i32
    return %c0_i32, %arg0 : i32, i32
  }
  func.func @transform_2(%arg0: i32, %arg1: memref<12xi32, #tpu.memory_space<smem>>) -> (i32, i32) {
    %c0_i32 = arith.constant 0 : i32
    %c0_i32_0 = arith.constant 0 : i32
    return %c0_i32, %arg0 : i32, i32
  }
}

</mosaic_0001>

<bundles_post_ra>
// kernel: tpu_custom_call.1
= control target key start
LH: loop header
LB: loop body
LE: loop exit
PB: predicated region body
PF: predicated region fallthrough
CT: control target
= control target key end

     0   :  { %s262_s0 = inlined_call_operand.hbm [shape: s32[12], index: 0, kind: input, shape index: {}]   ;;  %s263_s1 = inlined_call_operand.vmem [shape: f32[1,128], index: 1, kind: input, shape index: {}]   ;;  %s264_s2 = inlined_call_operand.vmem [shape: f32[1,128], index: 2, kind: input, shape index: {}]   ;;  %s265_s3 = inlined_call_operand.hbm [shape: f32[1,128], index: 3, kind: output, shape index: {}]  }
   0x1   :  { %s164_s14 = scalar_lea.hbm %s262_s0, 16 }
   0x2   :  { %p165_p0 = scmp.ne.s32.totalorder %s262_s0, %s164_s14  ;;  %p168_p1 = scmp.lt.u32.totalorder %s164_s14, %s262_s0 }
   0x4   :  { %p170_p2 = pnand %p168_p1, %p165_p0 }
   0x6   :  { %173 = shalt.err (!%p170_p2)  }
   0x7   :  { %s200_s19 = smov [#allocation3]  }
   0x8   :  { %9 = dma.hbm_to_smem %s262_s0, 16, %s200_s19, [#allocation2] }
   0x9   :  { %196 = dma.done.wait [#allocation2], 16 }
   0xa   :  { %197 = vsyncadd [#allocation2], 4294967280 }
   0xb   :  { %11 = sfence }
   0xc   :  { %v20_v0 = vlaneseq  ;;  %s22_s22 = sld [smem:[#allocation3]]  ;;  %s133_s23 = sld [smem:[#allocation3 + $0x1]] }
   0xd   :  { %s135_s24 = sld [smem:[#allocation3 + $0x2]]  ;;  %s137_s25 = sld [smem:[#allocation3 + $0x3]] }
   0xe   :  { %v21_v1 = vand.u32 127, %v20_v0  ;;  %s139_s26 = sld [smem:[#allocation3 + $0x4]]  ;;  %s141_s27 = sld [smem:[#allocation3 + $0x5]] }
   0xf   :  { %s235_s28 = sld [smem:[#allocation3 + $0x6]] }
  0x10   :  { %12 = vsyncpa [#allocation5], 0  ;;  %s237_s29 = sld [smem:[#allocation3 + $0x7]]  ;;  %s239_s0 = sld [smem:[#allocation3 + $0x8]]  ;;  %v201_v5 = vmov 0.0   ;;  %vm97_vm13 = vcmask 1040384  }
  0x11   :  { %s149_s30 = sld [smem:[#allocation3 + $0x9]]  ;;  %s151_s4 = sld [smem:[#allocation3 + $0xa]]  ;;  %v17_v15 = vld [vmem:[%s263_s1] sm:$0x1] }
  0x12   :  { %v23_v2 = vstv %s22_s22  ;;  %v29_v3 = vstv %s133_s23  ;;  %s153_s7 = sld [smem:[#allocation3 + $0xb]]  ;;  %v18_v20 = vmul.f32 1.442695, %v17_v15  ;;  %v109_v51 = vld [vmem:[%s264_s2] sm:$0x1]  ;;  %s202_s11 = smov [#allocation4]  }
  0x13   :  { %vm24_vm0 = vcmp.eq.s32.totalorder %v21_v1, %v23_v2  ;;  %v35_v4 = vstv %s135_s24  ;;  %vm30_vm1 = vcmp.eq.s32.totalorder %v21_v1, %v29_v3  ;;  %v41_v7 = vstv %s137_s25  ;;  %s124_s12 = sshll.u32 %s202_s11, 4  ;;  %s125_s12 = int_to_ptr.vmem [resolvable:$true] %s124_s12 }
  0x14   :  { %v132_v6 = vsel %vm24_vm0, 1.0, %v201_v5  ;;  %vm36_vm2 = vcmp.eq.s32.totalorder %v21_v1, %v35_v4  ;;  %v134_v8 = vsel %vm30_vm1, 1.0, %v201_v5  ;;  %vm42_vm3 = vcmp.eq.s32.totalorder %v21_v1, %v41_v7  ;;  %s174_s13 = scalar_lea.vmem %s125_s12, 16  ;;  %s178_s14 = scalar_lea.vmem %s125_s12, 32 }
  0x15   :  { %v136_v9 = vsel %vm36_vm2, 1.0, %v201_v5  ;;  %v47_v10 = vstv %s139_s26  ;;  %v33_v11 = vadd.f32 %v134_v8, %v132_v6  ;;  %v53_v12 = vstv %s141_s27  ;;  %p175_p3 = scmp.ne.s32.totalorder %s125_s12, %s174_s13  ;;  %p179_p4 = scmp.lt.s32.totalorder %s125_s12, %s125_s12 }
  0x16   :  { %vm48_vm4 = vcmp.eq.s32.totalorder %v21_v1, %v47_v10  ;;  %v138_v13 = vsel %vm42_vm3, 1.0, %v201_v5  ;;  %v59_v14 = vstv %s235_s28  ;;  %vm54_vm5 = vcmp.eq.s32.totalorder %v21_v1, %v53_v12  ;;  %p180_p5 = scmp.lt.s32.totalorder %s178_s14, %s174_s13 }
  0x17   :  { %v39_v16 = vadd.f32 %v136_v9, %v33_v11  ;;  %v140_v17 = vsel %vm48_vm4, 1.0, %v201_v5  ;;  %v65_v18 = vstv %s237_s29  ;;  %vm60_vm6 = vcmp.eq.s32.totalorder %v21_v1, %v59_v14 }
  0x18   :  { %v142_v21 = vsel %vm54_vm5, 1.0, %v201_v5  ;;  %v71_v22 = vstv %s239_s0  ;;  %vm66_vm7 = vcmp.eq.s32.totalorder %v21_v1, %v65_v18  ;;  %v144_v24 = vsel %vm60_vm6, 1.0, %v201_v5  ;;  %p181_p6 = por %p180_p5, %p179_p4 }
  0x19   :  { %v45_v19 = vadd.f32 %v138_v13, %v39_v16  ;;  %v77_v25 = vstv %s149_s30  ;;  %vm72_vm8 = vcmp.eq.s32.totalorder %v21_v1, %v71_v22  ;;  %162 = vpow2.f32 %v18_v20 }
  0x1a   :  { %v146_v27 = vsel %vm66_vm7, 1.0, %v201_v5  ;;  %v83_v28 = vstv %s151_s4  ;;  %vm78_vm9 = vcmp.eq.s32.totalorder %v21_v1, %v77_v25  ;;  %v148_v30 = vsel %vm72_vm8, 1.0, %v201_v5  ;;  %p182_p7 = pnand %p181_p6, %p175_p3 }
  0x1b   :  { %v51_v23 = vadd.f32 %v140_v17, %v45_v19  ;;  %v89_v31 = vstv %s153_s7  ;;  %vm84_vm10 = vcmp.eq.s32.totalorder %v21_v1, %v83_v28  ;;  %v150_v33 = vsel %vm78_vm9, 1.0, %v201_v5 }
  0x1c   :  { %vm90_vm11 = vcmp.eq.s32.totalorder %v21_v1, %v89_v31  ;;  %v152_v35 = vsel %vm84_vm10, 1.0, %v201_v5 }
  0x1d   :  { %v57_v26 = vadd.f32 %v142_v21, %v51_v23  ;;  %v154_v37 = vsel %vm90_vm11, 1.0, %v201_v5 }
  0x1f   :  { %v63_v29 = vadd.f32 %v144_v24, %v57_v26 }
  0x21   :  { %v69_v32 = vadd.f32 %v146_v27, %v63_v29 }
  0x23   :  { %v75_v34 = vadd.f32 %v148_v30, %v69_v32  ;;  %v163_v39 = vpop.eup %162 }
  0x25   :  { %v81_v36 = vadd.f32 %v150_v33, %v75_v34 }
  0x27   :  { %v87_v38 = vadd.f32 %v152_v35, %v81_v36 }
  0x29   :  { %v93_v40 = vadd.f32 %v154_v37, %v87_v38 }
  0x2b   :  { %vm94_vm12 = vcmp.gt.f32.partialorder %v93_v40, 0.0  ;;  %v95_v41 = vmul.f32 %v163_v39, %v93_v40 }
  0x2d   :  { %v96_v42 = vsel %vm94_vm12, %v95_v41, 0.0 }
  0x2e   :  { %v98_v43 = vsel %vm97_vm13, %v96_v42, 0.0 }
  0x2f   :  { %99 = vadd.xlane.f32.xlu0 %v98_v43 }
  0xbc   :  { %v100_v44 = vpop.xlane.xlu0 %99 }
  0xbd   :  { %v101_v45 = vrot.slane %v100_v44, 4 }
  0xbf   :  { %v102_v46 = vadd.f32 %v101_v45, %v100_v44 }
  0xc1   :  { %v103_v47 = vrot.slane %v102_v46, 2 }
  0xc3   :  { %v104_v48 = vadd.f32 %v103_v47, %v102_v46 }
  0xc5   :  { %v105_v49 = vrot.slane %v104_v48, 1 }
  0xc7   :  { %v106_v50 = vadd.f32 %v105_v49, %v104_v48 }
  0xc9   :  { %157 = vpush %v106_v50 }
  0xfa   :  { %s158_s1 = spop %157 }
  0xfb   :  { %s108_s8 = smul.f32 0.083333336, %s158_s1 }
  0xfd   :  { %v110_v52 = vstv %s108_s8 }
  0xfe   :  { %v111_v53 = vsub.f32 %v109_v51, %v110_v52 }
 0x100   :  { %v112_v54 = vmul.f32 10.0, %v111_v53 }
 0x102   :  { %v113_v55 = vmul.f32 -0.5, %v112_v54 }
 0x104   :  { %v114_v56 = vmul.f32 %v113_v55, %v112_v54 }
 0x106   :  { %v155_v57 = vadd.f32 2.3025851, %v114_v56 }
 0x108   :  { %v156_v58 = vadd.f32 -0.9189385, %v155_v57 }
 0x10a   :  { %117 = vst [vmem:[#allocation4] sm:$0x1] %v156_v58 }
 0x10b   :  { %185 = shalt.err (!%p182_p7)
}
 0x10c   :  { %s186_s16 = scalar_lea.hbm %s265_s3, 16 }
 0x10d   :  { %p187_p8 = scmp.ne.s32.totalorder %s265_s3, %s186_s16  ;;  %p190_p9 = scmp.lt.u32.totalorder %s186_s16, %s265_s3 }
 0x10f   :  { %p192_p10 = pnand %p190_p9, %p187_p8 }
 0x111   :  { %195 = shalt.err (!%p192_p10)
}
 0x112   :  { %127 = dma.vmem_to_hbm [thread:$0]  %s125_s12, 16, %s265_s3, [#allocation5]  }
 0x113   :  { %198 = dma.done.wait [#allocation5], 16  }
 0x114   :  { %199 = vsyncadd [#allocation5], 4294967280 }
 0x115   :  { %131 = vsyncpa [#allocation5], 1 }

</bundles_post_ra>
